<compile_context>
chip_gen: v5e
topology: v5e:2x2
jax: 0.10.0
libtpu: 0.0.40
codegen_flags: <defaults>
</compile_context>

<pallas_src>
import jax
import jax.numpy as jnp
import numpy as np
from jax.experimental import pallas as pl
from jax.experimental.pallas import tpu as pltpu

# ---- problem sizes (small, consistent with the module) ----------------------
NUM_VISION_TOKENS = 8          # T : max tokens per instance (num_vision_tokens)
HIDDEN = 32                    # D : feature dim of `feat`
PATCH = 8                      # P : patch side produced by the synthetic decoder
CHANNELS = 3                   # C : RGB
PIX_DIM = PATCH * PATCH * CHANNELS   # = 192, pixels emitted per token


def _mae_pixel_loss_kernel(feat_ref, w_ref, b_ref, tgt_ref, wgt_ref, loss_ref):
    # decoder(feat) for ALL tokens of ALL instances at once (single MXU matmul):
    #   [L, D] @ [D, P*P*C] + bias  ->  [L, P*P*C]
    pred = jnp.dot(feat_ref[...], w_ref[...],
                   preferred_element_type=jnp.float32) + b_ref[...]
    # nn.L1Loss(mean) per instance, summed over present instances, is folded
    # into per-token weights  w[l] = 1 / (count_{mask[l]} * P*P*C):
    #   sum_l w[l] * sum_d |pred_l - tgt_l|  ==  sum_k mean_k
    diff = jnp.abs(pred - tgt_ref[...])
    # keepdims reduction -> value shape (1, 1) matches the output Ref shape.
    loss_ref[...] = jnp.sum(diff * wgt_ref[...], keepdims=True)


def mae_pixel_loss(feat, target_mask, dec_w, dec_b, targets):
    """feat: [L, D] f32; target_mask: [L] int32 in [0, K); dec_w: [D, PIX_DIM];
    dec_b: [1, PIX_DIM]; targets: [K, T, PIX_DIM] (ToTensor(resized PIL))."""
    L, _ = feat.shape
    K, _, P = targets.shape

    # --- instance metadata (cheap JAX index plumbing, not kernel work) --------
    onehot = (target_mask[:, None] ==
              jnp.arange(K, dtype=target_mask.dtype)[None, :])          # [L, K]
    counts = jnp.sum(onehot, axis=0).astype(jnp.int32)                  # [K]
    actual_len = jnp.sum(counts > 0).astype(jnp.float32)                # scalar

    # position of each token inside its instance (= row order of feat[idx])
    pos = jnp.cumsum(onehot.astype(jnp.int32), axis=0)[jnp.arange(L),
                                                       target_mask] - 1  # [L]
    tgt_tok = targets[target_mask, pos]                                  # [L, PIX_DIM]

    # per-token weight: summing weighted |diff| yields sum of per-instance means
    wgt_tok = (1.0 / (counts[target_mask].astype(jnp.float32) * P))[:, None]  # [L, 1]

    loss_sum = pl.pallas_call(
        _mae_pixel_loss_kernel,
        out_shape=jax.ShapeDtypeStruct((1, 1), jnp.float32),
        in_specs=[pl.BlockSpec(memory_space=pltpu.MemorySpace.VMEM)] * 5,
        out_specs=pl.BlockSpec(memory_space=pltpu.MemorySpace.VMEM),
    )(feat, dec_w, dec_b, tgt_tok, wgt_tok)

    # `loss / actual_len if actual_len > 0 else 0.0`
    return jnp.where(actual_len > 0, loss_sum[0, 0] / actual_len, 0.0)


# ---- pure-NumPy reference (mirrors the PyTorch forward) ----------------------
def _reference(feat, target_mask, w, b, targets, K):
    feat = np.asarray(feat); target_mask = np.asarray(target_mask)
    w = np.asarray(w); b = np.asarray(b); targets = np.asarray(targets)
    total, n = 0.0, 0
    for k in range(K):
        idx = target_mask == k
        cnt = int(idx.sum())
        if cnt == 0:
            continue
        n += 1
        pred = feat[idx] @ w + b                              # decoder(feat_k)
        total += np.mean(np.abs(pred - targets[k][:cnt]))     # nn.L1Loss()
    return total / n if n > 0 else 0.0


if __name__ == "__main__":
    K = 4                       # number of vision instances
    T = NUM_VISION_TOKENS
    D = HIDDEN

    key = jax.random.PRNGKey(0)
    k_feat, k_w, k_b, k_tgt = jax.random.split(key, 4)

    # instance 2 is absent (exercises the skip path), instance 1 is partial
    # (count=5), and instance tokens are interleaved -- all handled exactly.
    target_mask = jnp.asarray([0] * 4 + [1] * 3 + [0] * 4 + [1] * 2 + [3] * T,
                              dtype=jnp.int32)
    L = target_mask.shape[0]

    feat = jax.random.normal(k_feat, (L, D), dtype=jnp.float32)

    # deterministic synthetic decoder parameters (linear pixel decoder)
    dec_w = jax.random.normal(k_w, (D, PIX_DIM), dtype=jnp.float32) * 0.05
    dec_b = jax.random.normal(k_b, (1, PIX_DIM), dtype=jnp.float32) * 0.05

    # TODO(synk): PIL `.resize()` + torchvision ToTensor have no Pallas
    # equivalent; the resized-image pixel targets are generated directly here.
    targets = jax.random.uniform(k_tgt, (K, T, PIX_DIM), dtype=jnp.float32)

    out = mae_pixel_loss(feat, target_mask, dec_w, dec_b, targets)
    out = jax.block_until_ready(out)

    ref = _reference(feat, target_mask, dec_w, dec_b, targets, K)
    assert np.allclose(np.asarray(out), ref, rtol=1e-5, atol=1e-5), (out, ref)
    print("KERNEL_OK")
</pallas_src>

<mosaic_0001>
module attributes {stable_mosaic.version = 11 : i64} {
  func.func @_mae_pixel_loss_kernel(%arg0: memref<21x32xf32, #tpu.memory_space<vmem>>, %arg1: memref<32x192xf32, #tpu.memory_space<vmem>>, %arg2: memref<1x192xf32, #tpu.memory_space<vmem>>, %arg3: memref<21x192xf32, #tpu.memory_space<vmem>>, %arg4: memref<21x1xf32, #tpu.memory_space<vmem>>, %arg5: memref<1x1xf32, #tpu.memory_space<vmem>>) attributes {dimension_semantics = [], scalar_prefetch = 0 : i64, scratch_operands = 0 : i64, tpu.core_type = #tpu.core_type<tc>} {
    %c0 = arith.constant 0 : index
    %c0_0 = arith.constant 0 : index
    %0 = vector.load %arg0[%c0, %c0_0] : memref<21x32xf32, #tpu.memory_space<vmem>>, vector<21x32xf32>
    %c0_1 = arith.constant 0 : index
    %c0_2 = arith.constant 0 : index
    %1 = vector.load %arg1[%c0_1, %c0_2] : memref<32x192xf32, #tpu.memory_space<vmem>>, vector<32x192xf32>
    %cst = arith.constant dense<0.000000e+00> : vector<21x192xf32>
    %2 = tpu.matmul %0, %1, %cst {dimension_numbers = #tpu.dot_dimension_numbers<[1], [0], [0], [1], [0, 0, 1, 1], [], []>} : vector<21x32xf32>, vector<32x192xf32>, vector<21x192xf32> -> vector<21x192xf32>
    %c0_3 = arith.constant 0 : index
    %c0_4 = arith.constant 0 : index
    %3 = vector.load %arg2[%c0_3, %c0_4] : memref<1x192xf32, #tpu.memory_space<vmem>>, vector<1x192xf32>
    %4 = vector.broadcast %3 : vector<1x192xf32> to vector<21x192xf32>
    %5 = arith.addf %2, %4 : vector<21x192xf32>
    %c0_5 = arith.constant 0 : index
    %c0_6 = arith.constant 0 : index
    %6 = vector.load %arg3[%c0_5, %c0_6] : memref<21x192xf32, #tpu.memory_space<vmem>>, vector<21x192xf32>
    %7 = arith.subf %5, %6 : vector<21x192xf32>
    %8 = math.absf %7 : vector<21x192xf32>
    %c0_7 = arith.constant 0 : index
    %c0_8 = arith.constant 0 : index
    %9 = vector.load %arg4[%c0_7, %c0_8] : memref<21x1xf32, #tpu.memory_space<vmem>>, vector<21x1xf32>
    %10 = vector.broadcast %9 : vector<21x1xf32> to vector<21x192xf32>
    %11 = arith.mulf %8, %10 : vector<21x192xf32>
    %12 = vector.shape_cast %11 : vector<21x192xf32> to vector<1x21x192xf32>
    %cst_9 = arith.constant dense<0.000000e+00> : vector<1xf32>
    %13 = vector.multi_reduction <add>, %12, %cst_9 [1, 2] : vector<1x21x192xf32> to vector<1xf32>
    %14 = vector.shape_cast %13 : vector<1xf32> to vector<1x1x1xf32>
    %15 = vector.extract %14[0, 0, 0] : f32 from vector<1x1x1xf32>
    %16 = vector.broadcast %15 : f32 to vector<1x1xf32>
    %c0_10 = arith.constant 0 : index
    %c0_11 = arith.constant 0 : index
    %17 = vector.load %arg5[%c0_10, %c0_11] : memref<1x1xf32, #tpu.memory_space<vmem>>, vector<1x1xf32>
    tpu.vector_store %arg5[%c0_10, %c0_11], %16 {strides = array<i32>} : memref<1x1xf32, #tpu.memory_space<vmem>>, vector<1x1xf32>,
    return
  }
}

</mosaic_0001>

<bundles_post_ra>
// kernel: tpu_custom_call.1
= control target key start
LH: loop header
LB: loop body
LE: loop exit
PB: predicated region body
PF: predicated region fallthrough
CT: control target
= control target key end

     0   :  { %10 = vsyncpa [#allocation3], 0  ;;  %s431_s0 = inlined_call_operand.vmem [shape: f32[21,32], index: 0, kind: input, shape index: {}]   ;;  %s432_s1 = inlined_call_operand.hbm [shape: f32[32,192], index: 1, kind: input, shape index: {}]   ;;  %s433_s2 = inlined_call_operand.hbm [shape: f32[1,192], index: 2, kind: input, shape index: {}]   ;;  %s434_s3 = inlined_call_operand.hbm [shape: f32[21,192], index: 3, kind: input, shape index: {}]   ;;  %s435_s4 = inlined_call_operand.vmem [shape: f32[21,1], index: 4, kind: input, shape index: {}]   ;;  %s436_s5 = inlined_call_operand.hbm [shape: f32[1,1], index: 5, kind: output, shape index: {}]  }
   0x1   :  { %11 = vsyncpa [#allocation6], 0  ;;  %s33_s20 = sshll.u32 %s433_s2, 4  ;;  %s34_s20 = int_to_ptr.hbm [resolvable:$true] %s33_s20 }
   0x2   :  { %12 = vsyncpa [#allocation4], 0  ;;  %s356_s21 = smov [#allocation5]   ;;  %s19_s25 = sshll.u32 %s432_s1, 4  ;;  %s20_s25 = int_to_ptr.hbm [resolvable:$true] %s19_s25 }
   0x3   :  { %s35_s22 = sshll.u32 %s356_s21, 4  ;;  %s357_s26 = smov [#allocation2]   ;;  %s36_s22 = int_to_ptr.vmem [resolvable:$true] %s35_s22 }
   0x4   :  { %38 = dma.hbm_to_vmem [thread:$0]  %s34_s20, 32, %s36_s22, [#allocation6]  }
   0x5   :  { %s21_s27 = sshll.u32 %s357_s26, 4  ;;  %s358_s28 = smov 256   ;;  %s22_s27 = int_to_ptr.vmem [resolvable:$true] %s21_s27 }
   0x6   :  { %s359_s29 = smov 16   ;;  %s43_s2 = sshll.u32 %s434_s3, 4  ;;  %s44_s2 = int_to_ptr.hbm [resolvable:$true] %s43_s2 }
   0x7   :  { %27 = dma.hbm_to_vmem [thread:$0]  %s20_s25, 1024, %s22_s27, [#allocation3], %s358_s28, %s358_s28, %s359_s29  }
   0x8   :  { %s360_s7 = smov [#allocation7]  }
   0x9   :  { %s45_s8 = sshll.u32 %s360_s7, 4  ;;  %s46_s8 = int_to_ptr.vmem [resolvable:$true] %s45_s8 }
   0xa   :  { %51 = dma.hbm_to_vmem [thread:$0]  %s44_s2, 768, %s46_s8, [#allocation6], %s358_s28, %s358_s28, %s359_s29  }
   0xb   :  { %350 = dma.done.wait [#allocation3], 1024  }
   0xc   :  { %351 = vsyncadd [#allocation3], 4294966272 }
   0xd   :  { %352 = dma.done.wait [#allocation6], 800  }
   0xe   :  { %353 = vsyncadd [#allocation6], 4294966496  ;;  %v361_v0 = vmov 0   ;;  %v75_v1 = vld [vmem:[#allocation2 + $0x30] sm:$0xff]  ;;  %v76_v2 = vld [vmem:[#allocation2 + $0x38] sm:$0xff]  ;;  %vm83_vm0 = vcmask 261120  }
   0xf   :  { %252 = vset.pattern.permute.xlu0 %v361_v0  ;;  %253 = vset.pattern.permute.xlu1 %v361_v0  ;;  %v73_v3 = vld [vmem:[#allocation2 + $0x20] sm:$0xff]  ;;  %v74_v4 = vld [vmem:[#allocation2 + $0x28] sm:$0xff]  ;;  %v71_v5 = vld [vmem:[#allocation2 + $0x10] sm:$0xff]  ;;  %vm187_vm1 = vcmask 523264   ;;  %vm193_vm2 = vcmask 1044480   ;;  %vm196_vm3 = vcmask 520192  }
  0x10   :  { %235 = vmatpush.msra.mxu2 %v75_v1  ;;  %239 = vmatpush.msra.mxu3 %v76_v2  ;;  %v72_v6 = vld [vmem:[#allocation2 + $0x18] sm:$0xff]  ;;  %v69_v7 = vld [vmem:[#allocation2] sm:$0xff]  ;;  %v70_v8 = vld [vmem:[#allocation2 + $0x8] sm:$0xff]  ;;  %s218_s21 = sshll.u32 %s436_s5, 4  ;;  %vm209_vm4 = vcmask 0   ;;  %s219_s21 = int_to_ptr.hbm [resolvable:$true] %s218_s21 }
  0x11   :  { %131 = vmatpush.msra.mxu1 %v76_v2  ;;  %105 = vmatpush.msra.mxu0 %v75_v1  ;;  %v67_v9 = vld [vmem:[%s431_s0 + $0x8] sm:$0xff]  ;;  %v66_v10 = vld [vmem:[%s431_s0] sm:$0xff]  ;;  %v165_v12 = vld [vmem:[%s435_s4 + $0x10] sm:$0x1f] }
  0x12   :  { %236 = vmatpush.msra.mxu2 %v73_v3  ;;  %240 = vmatpush.msra.mxu3 %v74_v4  ;;  %v163_v11 = vld [vmem:[%s435_s4] sm:$0xff]  ;;  %v68_v13 = vld [vmem:[%s431_s0 + $0x10] sm:$0x1f]  ;;  %v164_v14 = vld [vmem:[%s435_s4 + $0x8] sm:$0xff]  ;;  %s362_s0 = smov [#allocation8]  }
  0x13   :  { %132 = vmatpush.msra.mxu1 %v74_v4  ;;  %106 = vmatpush.msra.mxu0 %v73_v3  ;;  %v77_v15 = vld [vmem:[#allocation5] sm:$0x3]  ;;  %v146_v19 = vld [vmem:[#allocation7 + $0x8] sm:$0xff]  ;;  %v145_v21 = vld [vmem:[#allocation7] sm:$0xff]  ;;  %s216_s4 = sshll.u32 %s362_s0, 4  ;;  %s217_s4 = int_to_ptr.vmem [resolvable:$true] %s216_s4 }
  0x14   :  { %237 = vmatpush.msra.mxu2 %v71_v5  ;;  %241 = vmatpush.msra.mxu3 %v72_v6  ;;  %v80_v16 = vperm.slane %v77_v15, 1  ;;  %v79_v17 = vperm.slane %v77_v15, 0  ;;  %v147_v28 = vld [vmem:[#allocation7 + $0x10] sm:$0xff]  ;;  %v148_v30 = vld [vmem:[#allocation7 + $0x18] sm:$0xff]  ;;  %v149_v46 = vld [vmem:[#allocation7 + $0x20] sm:$0x1f] }
  0x15   :  { %133 = vmatpush.msra.mxu1 %v72_v6  ;;  %107 = vmatpush.msra.mxu0 %v71_v5  ;;  %v150_v48 = vld [vmem:[#allocation7 + $0x28] sm:$0x1f] }
  0x16   :  { %238 = vmatpush.msra.mxu2 %v69_v7  ;;  %242 = vmatpush.msra.mxu3 %v70_v8 }
  0x17   :  { %230 = vmatmul.msk.f32.vlgmr.msra.gmra.mxu2 %vm83_vm0, %v67_v9  ;;  %233 = vmatmul.msk.f32.vlgmr.msra.gmra.mxu3 %vm83_vm0, %v67_v9 }
  0x18   :  { %134 = vmatpush.msra.mxu1 %v70_v8  ;;  %108 = vmatpush.msra.mxu0 %v69_v7 }
  0x19   :  { %232 = vmatmul.msk.f32.vlgmr.msra.gmra.mxu1 %vm83_vm0, %v66_v10  ;;  %229 = vmatmul.msk.f32.vlgmr.msra.gmra.mxu0 %vm83_vm0, %v66_v10 }
  0x1a   :  { %168 = vperm.xlu0 %252, %v163_v11   ;;  %178 = vperm.xlu1 %253, %v165_v12  }
  0x1f   :  { %231 = vmatmul.msk.f32.gmra.mxu2 %vm83_vm0, %v68_v13  ;;  %234 = vmatmul.msk.f32.gmra.mxu3 %vm83_vm0, %v68_v13 }
  0x22   :  { %173 = vperm.xlu0 %252, %v164_v14  }
  0x8c   :  { %v169_v22 = vpop.permute.xlu0 %168  ;;  %v179_v55 = vpop.permute.xlu1 %178 }
  0x94   :  { %v174_v42 = vpop.permute.xlu0 %173 }
  0x96   :  { %v136_v18 = vpop.f32.mrf.mxu1  ;;  %v110_v20 = vpop.f32.mrf.mxu0 }
  0x97   :  { %v137_v23 = vadd.f32 %v136_v18, %v80_v16  ;;  %v111_v24 = vadd.f32 %v110_v20, %v79_v17 }
  0x99   :  { %v152_v25 = vsub.f32 %v137_v23, %v146_v19  ;;  %v151_v26 = vsub.f32 %v111_v24, %v145_v21 }
  0x9a   :  { %v113_v27 = vpop.f32.mrf.mxu2  ;;  %v139_v29 = vpop.f32.mrf.mxu3 }
  0x9b   :  { %v158_v31 = vand.u32 2147483647, %v152_v25  ;;  %v157_v32 = vand.u32 2147483647, %v151_v26  ;;  %v114_v33 = vadd.f32 %v113_v27, %v79_v17  ;;  %v140_v34 = vadd.f32 %v139_v29, %v80_v16 }
  0x9d   :  { %v182_v35 = vmul.f32 %v169_v22, %v158_v31  ;;  %v153_v36 = vsub.f32 %v114_v33, %v147_v28  ;;  %v154_v37 = vsub.f32 %v140_v34, %v148_v30  ;;  %v181_v38 = vmul.f32 %v169_v22, %v157_v32 }
  0x9f   :  { %v159_v39 = vand.u32 2147483647, %v153_v36  ;;  %v160_v40 = vand.u32 2147483647, %v154_v37  ;;  %v188_v41 = vsel %vm187_vm1, %v182_v35, 0.0 }
  0xa0   :  { %v189_v44 = vadd.f32 %v188_v41, %v181_v38 }
  0xa1   :  { %v183_v43 = vmul.f32 %v174_v42, %v159_v39  ;;  %v184_v49 = vmul.f32 %v174_v42, %v160_v40 }
  0xa2   :  { %v116_v45 = vpop.f32.mrf.mxu2  ;;  %v142_v47 = vpop.f32.mrf.mxu3 }
  0xa3   :  { %v117_v50 = vadd.f32 %v116_v45, %v79_v17  ;;  %v143_v51 = vadd.f32 %v142_v47, %v80_v16  ;;  %v190_v54 = vadd.f32 %v189_v44, %v183_v43  ;;  %v191_v56 = vsel %vm187_vm1, %v184_v49, 0.0 }
  0xa5   :  { %v155_v52 = vsub.f32 %v117_v50, %v149_v46  ;;  %v156_v53 = vsub.f32 %v143_v51, %v150_v48  ;;  %v192_v61 = vadd.f32 %v191_v56, %v190_v54 }
  0xa7   :  { %v161_v57 = vand.u32 2147483647, %v155_v52  ;;  %v162_v58 = vand.u32 2147483647, %v156_v53 }
  0xa9   :  { %v185_v59 = vmul.f32 %v179_v55, %v161_v57  ;;  %v186_v60 = vmul.f32 %v179_v55, %v162_v58 }
  0xab   :  { %v194_v62 = vsel %vm193_vm2, %v185_v59, 0.0  ;;  %v197_v0 = vsel %vm196_vm3, %v186_v60, 0.0 }
  0xac   :  { %v195_v63 = vadd.f32 %v194_v62, %v192_v61 }
  0xae   :  { %v198_v1 = vadd.f32 %v197_v0, %v195_v63 }
  0xb0   :  { %199 = vadd.xlane.f32.xlu1 %v198_v1 }
 0x123   :  { %v200_v2 = vpop.xlane.xlu1 %199 }
 0x124   :  { %v201_v3 = vrot.slane %v200_v2, 4 }
 0x126   :  { %v202_v4 = vadd.f32 %v201_v3, %v200_v2 }
 0x128   :  { %v203_v5 = vrot.slane %v202_v4, 2 }
 0x12a   :  { %v204_v6 = vadd.f32 %v203_v5, %v202_v4 }
 0x12c   :  { %v205_v7 = vrot.slane %v204_v6, 1 }
 0x12e   :  { %v206_v8 = vadd.f32 %v205_v7, %v204_v6 }
 0x130   :  { %243 = vpush %v206_v8 }
 0x161   :  { %s244_s22 = spop %243 }
 0x162   :  { %v208_v9 = vstv %s244_s22 }
 0x163   :  { %210 = vst.msk [vmem:[#allocation8] sm:$0x1] %vm209_vm4, %v208_v9 }
 0x164   :  { %221 = dma.vmem_to_hbm [thread:$0]  %s217_s4, 16, %s219_s21, [#allocation4]  }
 0x165   :  { %354 = dma.done.wait [#allocation4], 16  }
 0x166   :  { %355 = vsyncadd [#allocation4], 4294967280 }
 0x167   :  { %226 = vsyncpa [#allocation3], 1 }
 0x168   :  { %227 = vsyncpa [#allocation6], 1 }
 0x169   :  { %228 = vsyncpa [#allocation4], 1 }

</bundles_post_ra>
